<compile_context>
chip_gen: v5e
topology: v5e:2x2
jax: 0.10.0
libtpu: 0.0.40
codegen_flags: <defaults>
</compile_context>

<pallas_src>
import functools
import math

import jax
import jax.numpy as jnp
from jax.experimental import pallas as pl
from jax.experimental.pallas import tpu as pltpu

_LANES = 128
_TARGET_TILE_ROWS = 8192  # 8192 * 128 * 4 B = 4 MiB per output block


def _copy_kernel(pat_ref, o_ref):
    """Stream the precomputed one-hot pattern tile to the output tile.

    The pattern's BlockSpec index_map is constant, so Pallas fetches it once
    per core; the steady state is one vld + one vst per vreg, no VALU math.
    """
    o_ref[...] = pat_ref[...]


def _round_up(x, m):
    return ((x + m - 1) // m) * m


def _lcm(a, b):
    return a * b // math.gcd(a, b)


@functools.lru_cache(maxsize=None)
def _flat_pattern(tile_rows, num_genres, gid):
    """(tile_rows, 128) f32 slab: row-major flattened one-hot rows, lane-dense."""
    idx = jnp.arange(tile_rows * _LANES, dtype=jnp.int32) % num_genres
    return (idx == gid).astype(jnp.float32).reshape(tile_rows, _LANES)


@functools.lru_cache(maxsize=None)
def _row_pattern(tile_b, num_genres, gid):
    """(tile_b, num_genres) f32: the one-hot genre row repeated over sublanes."""
    row = (jnp.arange(num_genres, dtype=jnp.int32) == gid).astype(jnp.float32)
    return jnp.tile(row[None, :], (tile_b, 1))


def _choose_tile(total_major, unit, target=_TARGET_TILE_ROWS):
    """Tile size along the major (second-to-last) dim.

    Multiple of `unit` (itself a multiple of 8), capped near `target`, and
    split into >= 2 grid steps when possible so v7x's two TensorCores both get
    work.  When total_major <= unit a single full-dim block is used (allowed by
    the full-dim exception to the (8, 128) rule).
    """
    if total_major <= unit:
        return total_major
    max_tile = max(unit, (target // unit) * unit)
    half = _round_up(-(-total_major // 2), unit)
    return min(max_tile, half)


def _broadcast_call(pattern, out_shape, tile_major, n_major):
    """pallas_call that writes `pattern` to every (tile_major, minor) tile."""
    tile_shape = pattern.shape  # (tile_major, minor) == one output block
    grid = (pl.cdiv(n_major, tile_major),)
    return pl.pallas_call(
        _copy_kernel,
        out_shape=jax.ShapeDtypeStruct(out_shape, jnp.float32),
        grid=grid,
        in_specs=[pl.BlockSpec(tile_shape, lambda i: (0, 0))],
        out_specs=pl.BlockSpec(tile_shape, lambda i: (i, 0)),
        compiler_params=pltpu.CompilerParams(
            dimension_semantics=("parallel",)),
    )(pattern)


def majority_classifier_forward(x, num_genres, majority_genre):
    """Pallas equivalent of MajorityClassifier.forward.

    x:              any array whose leading dim is the batch size (only the
                    shape is used, exactly like the PyTorch module).
    num_genres:     Python int, len(genre_labels).
    majority_genre: Python int, most_common_genre_id (baked at trace time).
    returns:        (batch, num_genres) float32 == one_hot.repeat(batch, 1).
    """
    batch_size = int(x.shape[0])
    num_genres = int(num_genres)
    gid = int(majority_genre)
    total = batch_size * num_genres

    if total % _LANES == 0 and total > 0:
        # Fast path: lane-dense (rows, 128) view of the flattened output so
        # every store is a full unmasked 128-lane vst.
        rows = total // _LANES
        period = num_genres // math.gcd(num_genres, _LANES)
        unit = _lcm(8, period)  # tile start offset stays a multiple of G
        tile_rows = _choose_tile(rows, unit)
        pattern = _flat_pattern(tile_rows, num_genres, gid)
        out_flat = _broadcast_call(pattern, (rows, _LANES), tile_rows, rows)
        return out_flat.reshape(batch_size, num_genres)

    # Ragged fallback (B*G not a multiple of 128): batch-tiled (tile_B, G)
    # blocks (last dim = full G satisfies the full-dim exception).  Stores are
    # lane-masked for G < 128, but VMEM stays bounded for any batch size.
    tile_b = _choose_tile(batch_size, 8)
    pattern = _row_pattern(tile_b, num_genres, gid)
    return _broadcast_call(pattern, (batch_size, num_genres), tile_b, batch_size)


class MajorityClassifier:
    """JAX/Pallas mirror of the PyTorch module (metadata supplied directly)."""

    def __init__(self, num_genres, majority_genre):
        # TODO(synk): DatasetMetadata.from_filepath (file I/O) is replaced by
        # passing num_genres / most_common_genre_id explicitly.
        self.num_genres = int(num_genres)
        self.majority_genre = int(majority_genre)
        self.majority_genre_hot = (
            jnp.zeros((self.num_genres,), dtype=jnp.float32)
            .at[self.majority_genre].set(1.0))

    def forward(self, x):
        return majority_classifier_forward(x, self.num_genres, self.majority_genre)

    __call__ = forward


if __name__ == "__main__":
    num_genres = 8
    majority_genre = 3  # most_common_genre_id
    clf = MajorityClassifier(num_genres, majority_genre)
    ref_row = clf.majority_genre_hot

    key = jax.random.PRNGKey(0)

    # Case 1: small batch (B*G = 16, not a multiple of 128) -> ragged batch-tiled path.
    x_small = jax.random.normal(key, (2, 4, 16, 16), dtype=jnp.float32)
    out_small = jax.block_until_ready(clf(x_small))
    assert out_small.shape == (2, num_genres)
    assert bool(jnp.all(out_small == jnp.tile(ref_row[None, :], (2, 1))))

    # Case 2: B*G % 128 == 0 -> lane-dense flat path, single full block.
    x_dense = jax.random.normal(key, (32, 4, 16, 16), dtype=jnp.float32)
    out_dense = jax.block_until_ready(clf(x_dense))
    assert out_dense.shape == (32, num_genres)
    assert bool(jnp.all(out_dense == jnp.tile(ref_row[None, :], (32, 1))))

    # Case 3: multi-tile lane-dense grid with a ragged last tile
    # (rows = 1040*8/128 = 65, tile_rows = 40 -> 2 grid steps, masked tail).
    x_big = jax.random.normal(key, (1040, 1, 1, 1), dtype=jnp.float32)
    out_big = jax.block_until_ready(clf(x_big))
    assert out_big.shape == (1040, num_genres)
    assert bool(jnp.all(out_big == ref_row[None, :]))

    print("KERNEL_OK")
</pallas_src>

<mosaic_0001>
module attributes {stable_mosaic.version = 11 : i64} {
  func.func @_copy_kernel(%arg0: i32, %arg1: memref<2x8xf32, #tpu.memory_space<vmem>>, %arg2: memref<2x8xf32, #tpu.memory_space<vmem>>) attributes {dimension_semantics = [#tpu.dimension_semantics<parallel>], iteration_bounds = array<i64: 1>, scalar_prefetch = 0 : i64, scratch_operands = 0 : i64, tpu.core_type = #tpu.core_type<tc>, window_params = [{pipeline_mode = #tpu.pipeline_mode<synchronous>, transform_indices = @transform_0, window_bounds = array<i64: 2, 8>}, {transform_indices = @transform_1, window_bounds = array<i64: 2, 8>}]} {
    %c0 = arith.constant 0 : index
    %c0_0 = arith.constant 0 : index
    %0 = vector.load %arg1[%c0, %c0_0] : memref<2x8xf32, #tpu.memory_space<vmem>>, vector<2x8xf32>
    %c0_1 = arith.constant 0 : index
    %c0_2 = arith.constant 0 : index
    %1 = vector.load %arg2[%c0_1, %c0_2] : memref<2x8xf32, #tpu.memory_space<vmem>>, vector<2x8xf32>
    tpu.vector_store %arg2[%c0_1, %c0_2], %0 {strides = array<i32>} : memref<2x8xf32, #tpu.memory_space<vmem>>, vector<2x8xf32>,
    return
  }
  func.func @transform_0(%arg0: i32) -> (i32, i32) {
    %c0_i32 = arith.constant 0 : i32
    %c0_i32_0 = arith.constant 0 : i32
    %c0_i32_1 = arith.constant 0 : i32
    return %c0_i32, %c0_i32_0 : i32, i32
  }
  func.func @transform_1(%arg0: i32) -> (i32, i32) {
    %c0_i32 = arith.constant 0 : i32
    %c0_i32_0 = arith.constant 0 : i32
    return %arg0, %c0_i32 : i32, i32
  }
}

</mosaic_0001>

<bundles_post_ra>
// kernel: tpu_custom_call.1
= control target key start
LH: loop header
LB: loop body
LE: loop exit
PB: predicated region body
PF: predicated region fallthrough
CT: control target
= control target key end

     0   :  { %6 = vsyncpa [#allocation3], 0  ;;  %s115_s0 = inlined_call_operand.hbm [shape: f32[2,8], index: 0, kind: input, shape index: {}]   ;;  %s116_s1 = inlined_call_operand.hbm [shape: f32[2,8], index: 1, kind: output, shape index: {}]  }
   0x1   :  { %7 = vsyncpa [#allocation4], 0  ;;  %s13_s8 = sshll.u32 %s115_s0, 4  ;;  %s97_s9 = smov [#allocation2]   ;;  %s14_s8 = int_to_ptr.hbm [resolvable:$true] %s13_s8 }
   0x2   :  { %s15_s10 = sshll.u32 %s97_s9, 4  ;;  %s16_s10 = int_to_ptr.vmem [resolvable:$true] %s15_s10 }
   0x3   :  { %18 = dma.hbm_to_vmem [thread:$0]  %s14_s8, 32, %s16_s10, [#allocation3]  }
   0x4   :  { %93 = dma.done.wait [#allocation3], 32  }
   0x5   :  { %94 = vsyncadd [#allocation3], 4294967264  ;;  %s98_s11 = smov [#allocation5]   ;;  %s33_s15 = sshll.u32 %s116_s1, 4  ;;  %vm24_vm0 = vcmask 58368   ;;  %s34_s15 = int_to_ptr.hbm [resolvable:$true] %s33_s15 }
   0x6   :  { %s31_s12 = sshll.u32 %s98_s11, 4  ;;  %v23_v0 = vld [vmem:[#allocation2] sm:$0x3]  ;;  %s32_s12 = int_to_ptr.vmem [resolvable:$true] %s31_s12 }
   0x7   :  { %25 = vst.msk [vmem:[#allocation5] sm:$0x3] %vm24_vm0, %v23_v0 }
   0x8   :  { %36 = dma.vmem_to_hbm [thread:$0]  %s32_s12, 32, %s34_s15, [#allocation4]  }
   0x9   :  { %95 = dma.done.wait [#allocation4], 32  }
   0xa   :  { %96 = vsyncadd [#allocation4], 4294967264 }
   0xb   :  { %41 = vsyncpa [#allocation3], 1 }
   0xc   :  { %42 = vsyncpa [#allocation4], 1 }

</bundles_post_ra>
